<compile_context>
chip_gen: v5e
topology: v5e:2x2
jax: 0.10.0
libtpu: 0.0.40
codegen_flags: <defaults>
</compile_context>

<pallas_src>
import functools

import jax
import jax.numpy as jnp
from jax.experimental import pallas as pl
from jax.experimental.pallas import tpu as pltpu

EPS = 1e-6  # PyTorch PairwiseDistance default eps (added to the difference)


def _round_up(v, m):
    return ((v + m - 1) // m) * m


def _cdiv(a, b):
    return -(-a // b)


def _device_defaults():
    """(num_parts, per-buffer streaming budget, vmem_limit) for this chip."""
    kind = ""
    try:
        kind = jax.devices()[0].device_kind.lower()
    except Exception:
        pass
    if "v7" in kind:                        # 2 TensorCores, 64 MiB VMEM per TC
        return 2, 4 * 1024 * 1024, 48 * 1024 * 1024
    if ("v4" in kind) or ("v5p" in kind):   # megacore: 2 TCs behind one device
        return 2, 8 * 1024 * 1024, 64 * 1024 * 1024
    # v5e / v6e / unknown: single TensorCore, 128 MiB VMEM
    return 1, 8 * 1024 * 1024, 64 * 1024 * 1024


def _csa_kernel(*refs, use_seg, r, n_pack, tn, tiles_per_part):
    if use_seg:
        (margin_ref, seg_ref, x_ref, y_ref, wpos_ref, wval_ref,
         out_ref, acc_ref) = refs
    else:
        (margin_ref, x_ref, y_ref, wpos_ref, wval_ref,
         out_ref, acc_ref) = refs

    p = pl.program_id(0)
    i = pl.program_id(1)

    @pl.when(i == 0)
    def _():
        acc_ref[...] = jnp.zeros_like(acc_ref)

    # Tiles scheduled only to round the grid up are skipped (their DMA was
    # clamped to the last valid block by the index_map; don't double count).
    @pl.when((p * tiles_per_part + i) * tn < n_pack)
    def _():
        margin = margin_ref[0]
        diff = (x_ref[...].astype(jnp.float32)
                - y_ref[...].astype(jnp.float32) + EPS)       # (tn, r*d) f32
        sq = diff * diff
        if use_seg:
            # Segmented per-original-row sum of squares on the MXU:
            # (tn, r*d) @ (r*d, r) block-diagonal ones -> (tn, r)
            dsq = jnp.dot(sq, seg_ref[...], preferred_element_type=jnp.float32)
        elif r > 1:
            dsq = sq                                           # d == 1 case
        else:
            dsq = jnp.sum(sq, axis=-1, keepdims=True)          # (tn, 1)

        w_val = wval_ref[...]          # 1 for real rows, 0 for padded / tail
        w_pos = wpos_ref[...]          # class_eq * valid
        # Zero-select the ragged tail before sqrt so garbage x/y rows cannot
        # leak NaN/Inf through the zero weights.  (Post-reduce chain is the
        # minimal lane-sparse op count; weights fold class_eq and validity.)
        dsq = jnp.where(w_val > 0.0, dsq, 0.0)
        dist = jnp.sqrt(dsq)
        hinge = jnp.maximum(margin - dist, 0.0)
        loss = w_pos * dsq + (w_val - w_pos) * (hinge * hinge)
        acc_ref[...] += jnp.sum(loss)

    @pl.when(i == pl.num_programs(1) - 1)
    def _():
        out_ref[...] = jnp.broadcast_to(acc_ref[...], out_ref.shape)


def csa_loss(x, y, class_eq, margin=1.0, *,
             block_budget_bytes=None, num_parts=None, vmem_limit_bytes=None):
    """Pallas TPU implementation of CSA.forward. Returns a scalar jnp.float32."""
    x = jnp.asarray(x)
    y = jnp.asarray(y)
    if not jnp.issubdtype(x.dtype, jnp.floating):
        x = x.astype(jnp.float32)
    if y.dtype != x.dtype:
        y = y.astype(x.dtype)
    n, d = x.shape
    ceq = jnp.asarray(class_eq, jnp.float32).reshape(n)

    auto_parts, auto_budget, auto_vmem = _device_defaults()
    if num_parts is None:
        num_parts = auto_parts
    if block_budget_bytes is None:
        block_budget_bytes = auto_budget
    if vmem_limit_bytes is None:
        vmem_limit_bytes = auto_vmem

    # Lane packing: r original rows per 128-lane row when d < 128 and d | 128.
    r = 128 // d if (d < 128 and 128 % d == 0) else 1
    dp = r * d

    # Pack x / y without materializing copies whenever possible.
    if r == 1:
        xp, yp = x, y
    elif n % r == 0:
        xp = x.reshape(n // r, dp)              # free metadata reshape
        yp = y.reshape(n // r, dp)
    else:                                       # only case needing a padded copy
        n_r = _cdiv(n, r) * r
        xp = jnp.zeros((n_r, d), x.dtype).at[:n].set(x).reshape(n_r // r, dp)
        yp = jnp.zeros((n_r, d), y.dtype).at[:n].set(y).reshape(n_r // r, dp)
    n_pack = xp.shape[0]

    # ---- Tile sizing ------------------------------------------------------
    row_bytes = dp * xp.dtype.itemsize
    min_steps = 3                               # keep the pipeline double-buffered

    def _plan(parts):
        rows_per_part = _cdiv(n_pack, parts)
        t = max(8, (block_budget_bytes // max(row_bytes, 1)) // 8 * 8)
        t = min(t, _round_up(rows_per_part, 8))
        if rows_per_part >= min_steps * 8:
            t = min(t, _round_up(_cdiv(rows_per_part, min_steps), 8))
        t = max(t, 8)
        return t, _cdiv(rows_per_part, t)

    tn, tiles_per_part = _plan(num_parts)
    # If a trailing part would sit entirely past the batch, drop the split.
    if num_parts > 1 and (num_parts - 1) * tiles_per_part * tn >= n_pack:
        num_parts = 1
        tn, tiles_per_part = _plan(1)

    n_valid_blocks = _cdiv(n_pack, tn)          # blocks that hold real rows
    last_block = n_valid_blocks - 1

    # ---- Tiny per-row weight planes (fold class_eq and row validity) -------
    n_w = n_valid_blocks * tn                   # weights are never read OOB
    w_pos = jnp.zeros((n_w * r,), jnp.float32).at[:n].set(ceq).reshape(n_w, r)
    w_val = jnp.zeros((n_w * r,), jnp.float32).at[:n].set(1.0).reshape(n_w, r)

    margin_arr = jnp.asarray(margin, jnp.float32).reshape(1)
    use_seg = (r > 1 and d > 1)

    def row_map(p_, i_):
        # Clamp so a rounded-up grid never issues a fully out-of-bounds DMA;
        # the redundant tiles are skipped inside the kernel.
        return (jnp.minimum(p_ * tiles_per_part + i_, last_block), 0)

    in_specs = [pl.BlockSpec(memory_space=pltpu.SMEM)]        # margin scalar
    inputs = [margin_arr]
    if use_seg:
        # Block-diagonal ones matrix for the segmented row reduce, built once
        # in the wrapper (constant index_map -> fetched once, reused).
        elem = jax.lax.broadcasted_iota(jnp.int32, (dp, r), 0)
        col = jax.lax.broadcasted_iota(jnp.int32, (dp, r), 1)
        seg = (elem // d == col).astype(jnp.float32)
        in_specs.append(pl.BlockSpec((dp, r), lambda p_, i_: (0, 0)))
        inputs.append(seg)
    in_specs += [
        pl.BlockSpec((tn, dp), row_map),        # x (source dtype)
        pl.BlockSpec((tn, dp), row_map),        # y (source dtype)
        pl.BlockSpec((tn, r), row_map),         # w_pos
        pl.BlockSpec((tn, r), row_map),         # w_val
    ]
    inputs += [xp, yp, w_pos, w_val]

    kernel = functools.partial(_csa_kernel, use_seg=use_seg, r=r,
                               n_pack=n_pack, tn=tn,
                               tiles_per_part=tiles_per_part)

    out = pl.pallas_call(
        kernel,
        out_shape=jax.ShapeDtypeStruct((num_parts * 8, 128), jnp.float32),
        grid_spec=pltpu.PrefetchScalarGridSpec(
            num_scalar_prefetch=0,
            grid=(num_parts, tiles_per_part),
            in_specs=in_specs,
            out_specs=pl.BlockSpec((8, 128), lambda p_, i_: (p_, 0)),
            scratch_shapes=[pltpu.VMEM((1, 1), jnp.float32)],
        ),
        compiler_params=pltpu.CompilerParams(
            dimension_semantics=("parallel", "arbitrary"),
            vmem_limit_bytes=vmem_limit_bytes,
        ),
    )(*inputs)

    partials = out[::8, 0]                      # one partial sum per parallel part
    return jnp.sum(partials) / jnp.float32(n)


def _csa_ref(x, y, class_eq, margin=1.0):
    # Pure-JAX reference mirroring the PyTorch module (computed in f32).
    x = jnp.asarray(x, jnp.float32)
    y = jnp.asarray(y, jnp.float32)
    diff = x - y + EPS
    dist = jnp.sqrt(jnp.sum(diff * diff, axis=-1))
    loss = class_eq * dist ** 2 + (1 - class_eq) * jnp.clip(margin - dist, 0.0) ** 2
    return jnp.mean(loss)


if __name__ == "__main__":
    key = jax.random.PRNGKey(0)

    checks = [
        # (N, D, margin, dtype, block_budget_bytes)
        (8, 32, 1.0, jnp.float32, None),            # r=4, free reshape, tiny batch
        (777, 64, 1.5, jnp.float32, None),          # r=2, odd batch -> minimal pad
        (1000, 64, 1.0, jnp.bfloat16, 128 * 1024),  # bf16 streaming, multi-step
        (300, 256, 1.0, jnp.float32, None),         # D >= 128 path (no packing)
    ]

    for idx, (n, d, margin, dtype, budget) in enumerate(checks):
        kx, ky, kc = jax.random.split(jax.random.fold_in(key, idx), 3)
        x = jax.random.normal(kx, (n, d), dtype=jnp.float32).astype(dtype)
        y = jax.random.normal(ky, (n, d), dtype=jnp.float32).astype(dtype)
        class_eq = jax.random.bernoulli(kc, 0.5, (n,)).astype(jnp.float32)

        out = csa_loss(x, y, class_eq, margin=margin, block_budget_bytes=budget)
        jax.block_until_ready(out)
        ref = _csa_ref(x, y, class_eq, margin=margin)
        assert jnp.allclose(out, ref, rtol=1e-5, atol=1e-5), (n, d, float(out), float(ref))

    print("KERNEL_OK")
</pallas_src>

<mosaic_0001>
module attributes {stable_mosaic.version = 11 : i64} {
  func.func @_csa_kernel(%arg0: i32, %arg1: i32, %arg2: memref<1xf32, #tpu.memory_space<smem>>, %arg3: memref<128x4xf32, #tpu.memory_space<vmem>>, %arg4: memref<8x128xf32, #tpu.memory_space<vmem>>, %arg5: memref<8x128xf32, #tpu.memory_space<vmem>>, %arg6: memref<8x4xf32, #tpu.memory_space<vmem>>, %arg7: memref<8x4xf32, #tpu.memory_space<vmem>>, %arg8: memref<8x128xf32, #tpu.memory_space<vmem>>, %arg9: memref<1x1xf32, #tpu.memory_space<vmem>>) attributes {dimension_semantics = [#tpu.dimension_semantics<parallel>, #tpu.dimension_semantics<arbitrary>], iteration_bounds = array<i64: 1, 1>, scalar_prefetch = 0 : i64, scratch_operands = 1 : i64, tpu.core_type = #tpu.core_type<tc>, window_params = [{transform_indices = @transform_0, window_bounds = array<i64: 1>}, {pipeline_mode = #tpu.pipeline_mode<synchronous>, transform_indices = @transform_1, window_bounds = array<i64: 128, 4>}, {transform_indices = @transform_2, window_bounds = array<i64: 8, 128>}, {transform_indices = @transform_3, window_bounds = array<i64: 8, 128>}, {transform_indices = @transform_4, window_bounds = array<i64: 8, 4>}, {transform_indices = @transform_5, window_bounds = array<i64: 8, 4>}, {transform_indices = @transform_6, window_bounds = array<i64: 8, 128>}]} {
    %c0_i32 = arith.constant 0 : i32
    %0 = arith.cmpi eq, %arg1, %c0_i32 : i32
    %1 = arith.extui %0 : i1 to i32
    %c0_i32_0 = arith.constant 0 : i32
    %2 = arith.cmpi ne, %1, %c0_i32_0 : i32
    scf.if %2 {
      %cst = arith.constant 0.000000e+00 : f32
      %12 = vector.broadcast %cst : f32 to vector<1x1xf32>
      %c0 = arith.constant 0 : index
      %c0_4 = arith.constant 0 : index
      %13 = vector.load %arg9[%c0, %c0_4] : memref<1x1xf32, #tpu.memory_space<vmem>>, vector<1x1xf32>
      tpu.vector_store %arg9[%c0, %c0_4], %12 {strides = array<i32>} : memref<1x1xf32, #tpu.memory_space<vmem>>, vector<1x1xf32>,
    } else {
    }
    %c1_i32 = arith.constant 1 : i32
    %3 = arith.muli %arg0, %c1_i32 : i32
    %4 = arith.addi %3, %arg1 : i32
    %c8_i32 = arith.constant 8 : i32
    %5 = arith.muli %4, %c8_i32 : i32
    %c2_i32 = arith.constant 2 : i32
    %6 = arith.cmpi slt, %5, %c2_i32 : i32
    %7 = arith.extui %6 : i1 to i32
    %c0_i32_1 = arith.constant 0 : i32
    %8 = arith.cmpi ne, %7, %c0_i32_1 : i32
    scf.if %8 {
      %c0 = arith.constant 0 : index
      %12 = memref.load %arg2[%c0] : memref<1xf32, #tpu.memory_space<smem>>
      %c0_4 = arith.constant 0 : index
      %c0_5 = arith.constant 0 : index
      %13 = vector.load %arg4[%c0_4, %c0_5] : memref<8x128xf32, #tpu.memory_space<vmem>>, vector<8x128xf32>
      %c0_6 = arith.constant 0 : index
      %c0_7 = arith.constant 0 : index
      %14 = vector.load %arg5[%c0_6, %c0_7] : memref<8x128xf32, #tpu.memory_space<vmem>>, vector<8x128xf32>
      %15 = arith.subf %13, %14 : vector<8x128xf32>
      %cst = arith.constant 9.99999997E-7 : f32
      %16 = vector.broadcast %cst : f32 to vector<8x128xf32>
      %17 = arith.addf %15, %16 : vector<8x128xf32>
      %18 = arith.mulf %17, %17 : vector<8x128xf32>
      %c0_8 = arith.constant 0 : index
      %c0_9 = arith.constant 0 : index
      %19 = vector.load %arg3[%c0_8, %c0_9] : memref<128x4xf32, #tpu.memory_space<vmem>>, vector<128x4xf32>
      %cst_10 = arith.constant dense<0.000000e+00> : vector<8x4xf32>
      %20 = tpu.matmul %18, %19, %cst_10 {dimension_numbers = #tpu.dot_dimension_numbers<[1], [0], [0], [1], [0, 0, 1, 1], [], []>} : vector<8x128xf32>, vector<128x4xf32>, vector<8x4xf32> -> vector<8x4xf32>
      %c0_11 = arith.constant 0 : index
      %c0_12 = arith.constant 0 : index
      %21 = vector.load %arg7[%c0_11, %c0_12] : memref<8x4xf32, #tpu.memory_space<vmem>>, vector<8x4xf32>
      %c0_13 = arith.constant 0 : index
      %c0_14 = arith.constant 0 : index
      %22 = vector.load %arg6[%c0_13, %c0_14] : memref<8x4xf32, #tpu.memory_space<vmem>>, vector<8x4xf32>
      %cst_15 = arith.constant 0.000000e+00 : f32
      %23 = vector.broadcast %cst_15 : f32 to vector<8x4xf32>
      %24 = arith.cmpf ogt, %21, %23 : vector<8x4xf32>
      %cst_16 = arith.constant 0.000000e+00 : f32
      %25 = vector.broadcast %cst_16 : f32 to vector<8x4xf32>
      %26 = arith.select %24, %20, %25 : vector<8x4xi1>, vector<8x4xf32>
      %27 = math.sqrt %26 : vector<8x4xf32>
      %28 = vector.broadcast %12 : f32 to vector<8x4xf32>
      %29 = arith.subf %28, %27 : vector<8x4xf32>
      %cst_17 = arith.constant 0.000000e+00 : f32
      %30 = vector.broadcast %cst_17 : f32 to vector<8x4xf32>
      %31 = arith.maximumf %29, %30 : vector<8x4xf32>
      %32 = arith.mulf %22, %26 : vector<8x4xf32>
      %33 = arith.subf %21, %22 : vector<8x4xf32>
      %34 = arith.mulf %31, %31 : vector<8x4xf32>
      %35 = arith.mulf %33, %34 : vector<8x4xf32>
      %36 = arith.addf %32, %35 : vector<8x4xf32>
      %c0_18 = arith.constant 0 : index
      %c0_19 = arith.constant 0 : index
      %37 = vector.load %arg9[%c0_18, %c0_19] : memref<1x1xf32, #tpu.memory_space<vmem>>, vector<1x1xf32>
      %38 = vector.shape_cast %36 : vector<8x4xf32> to vector<1x8x4xf32>
      %cst_20 = arith.constant dense<0.000000e+00> : vector<1xf32>
      %39 = vector.multi_reduction <add>, %38, %cst_20 [1, 2] : vector<1x8x4xf32> to vector<1xf32>
      %40 = vector.shape_cast %39 : vector<1xf32> to vector<1x1x1xf32>
      %41 = vector.extract %40[0, 0, 0] : f32 from vector<1x1x1xf32>
      %42 = vector.broadcast %41 : f32 to vector<1x1xf32>
      %43 = arith.addf %37, %42 : vector<1x1xf32>
      %c0_21 = arith.constant 0 : index
      %c0_22 = arith.constant 0 : index
      %44 = vector.load %arg9[%c0_21, %c0_22] : memref<1x1xf32, #tpu.memory_space<vmem>>, vector<1x1xf32>
      tpu.vector_store %arg9[%c0_21, %c0_22], %43 {strides = array<i32>} : memref<1x1xf32, #tpu.memory_space<vmem>>, vector<1x1xf32>,
    } else {
    }
    %c0_i32_2 = arith.constant 0 : i32
    %9 = arith.cmpi eq, %arg1, %c0_i32_2 : i32
    %10 = arith.extui %9 : i1 to i32
    %c0_i32_3 = arith.constant 0 : i32
    %11 = arith.cmpi ne, %10, %c0_i32_3 : i32
    scf.if %11 {
      %c0 = arith.constant 0 : index
      %c0_4 = arith.constant 0 : index
      %12 = vector.load %arg9[%c0, %c0_4] : memref<1x1xf32, #tpu.memory_space<vmem>>, vector<1x1xf32>
      %13 = vector.shape_cast %12 : vector<1x1xf32> to vector<1x1xf32>
      %14 = vector.broadcast %13 : vector<1x1xf32> to vector<8x128xf32>
      %c0_5 = arith.constant 0 : index
      %c0_6 = arith.constant 0 : index
      %15 = vector.load %arg8[%c0_5, %c0_6] : memref<8x128xf32, #tpu.memory_space<vmem>>, vector<8x128xf32>
      tpu.vector_store %arg8[%c0_5, %c0_6], %14 {strides = array<i32>} : memref<8x128xf32, #tpu.memory_space<vmem>>, vector<8x128xf32>,
    } else {
    }
    return
  }
  func.func @transform_0(%arg0: i32, %arg1: i32) -> i32 {
    %c0_i32 = arith.constant 0 : i32
    %c0_i32_0 = arith.constant 0 : i32
    return %c0_i32 : i32
  }
  func.func @transform_1(%arg0: i32, %arg1: i32) -> (i32, i32) {
    %c0_i32 = arith.constant 0 : i32
    %c0_i32_0 = arith.constant 0 : i32
    %c0_i32_1 = arith.constant 0 : i32
    return %c0_i32, %c0_i32_0 : i32, i32
  }
  func.func @transform_2(%arg0: i32, %arg1: i32) -> (i32, i32) {
    %c1_i32 = arith.constant 1 : i32
    %0 = arith.muli %arg0, %c1_i32 : i32
    %1 = arith.addi %0, %arg1 : i32
    %c0_i32 = arith.constant 0 : i32
    %2 = arith.minsi %1, %c0_i32 : i32
    %c0_i32_0 = arith.constant 0 : i32
    %c0_i32_1 = arith.constant 0 : i32
    return %2, %c0_i32_0 : i32, i32
  }
  func.func @transform_3(%arg0: i32, %arg1: i32) -> (i32, i32) {
    %c1_i32 = arith.constant 1 : i32
    %0 = arith.muli %arg0, %c1_i32 : i32
    %1 = arith.addi %0, %arg1 : i32
    %c0_i32 = arith.constant 0 : i32
    %2 = arith.minsi %1, %c0_i32 : i32
    %c0_i32_0 = arith.constant 0 : i32
    %c0_i32_1 = arith.constant 0 : i32
    return %2, %c0_i32_0 : i32, i32
  }
  func.func @transform_4(%arg0: i32, %arg1: i32) -> (i32, i32) {
    %c1_i32 = arith.constant 1 : i32
    %0 = arith.muli %arg0, %c1_i32 : i32
    %1 = arith.addi %0, %arg1 : i32
    %c0_i32 = arith.constant 0 : i32
    %2 = arith.minsi %1, %c0_i32 : i32
    %c0_i32_0 = arith.constant 0 : i32
    %c0_i32_1 = arith.constant 0 : i32
    return %2, %c0_i32_0 : i32, i32
  }
  func.func @transform_5(%arg0: i32, %arg1: i32) -> (i32, i32) {
    %c1_i32 = arith.constant 1 : i32
    %0 = arith.muli %arg0, %c1_i32 : i32
    %1 = arith.addi %0, %arg1 : i32
    %c0_i32 = arith.constant 0 : i32
    %2 = arith.minsi %1, %c0_i32 : i32
    %c0_i32_0 = arith.constant 0 : i32
    %c0_i32_1 = arith.constant 0 : i32
    return %2, %c0_i32_0 : i32, i32
  }
  func.func @transform_6(%arg0: i32, %arg1: i32) -> (i32, i32) {
    %c0_i32 = arith.constant 0 : i32
    %c0_i32_0 = arith.constant 0 : i32
    return %arg0, %c0_i32 : i32, i32
  }
}

</mosaic_0001>

<bundles_post_ra>
// kernel: tpu_custom_call.1
= control target key start
LH: loop header
LB: loop body
LE: loop exit
PB: predicated region body
PF: predicated region fallthrough
CT: control target
= control target key end

     0   :  { %s449_s0 = inlined_call_operand.<no memory space> [shape: f32[1], index: 0, kind: input, shape index: {}]   ;;  %s450_s1 = inlined_call_operand.vmem [shape: f32[128,4], index: 1, kind: input, shape index: {}]   ;;  %s451_s2 = inlined_call_operand.vmem [shape: f32[2,128], index: 2, kind: input, shape index: {}]   ;;  %s452_s3 = inlined_call_operand.vmem [shape: f32[2,128], index: 3, kind: input, shape index: {}]   ;;  %s453_s4 = inlined_call_operand.vmem [shape: f32[8,4], index: 4, kind: input, shape index: {}]   ;;  %s454_s5 = inlined_call_operand.vmem [shape: f32[8,4], index: 5, kind: input, shape index: {}]   ;;  %s455_s6 = inlined_call_operand.hbm [shape: f32[8,128], index: 6, kind: output, shape index: {}]  }
   0x1   :  { %v196_v0 = vld [vmem:[%s450_s1 + $0x78] sm:$0xff]  ;;  %v195_v1 = vld [vmem:[%s450_s1 + $0x70] sm:$0xff]  ;;  %v194_v2 = vld [vmem:[%s450_s1 + $0x68] sm:$0xff] }
   0x2   :  { %197 = vmatpush.msra.mxu0 %v196_v0  ;;  %v193_v3 = vld [vmem:[%s450_s1 + $0x60] sm:$0xff]  ;;  %v192_v4 = vld [vmem:[%s450_s1 + $0x58] sm:$0xff] }
   0x4   :  { %198 = vmatpush.msra.mxu0 %v195_v1 }
   0x6   :  { %199 = vmatpush.msra.mxu0 %v194_v2 }
   0x7   :  { %12 = vsyncpa [#allocation5], 0  ;;  %v191_v5 = vld [vmem:[%s450_s1 + $0x50] sm:$0xff]  ;;  %v190_v6 = vld [vmem:[%s450_s1 + $0x48] sm:$0xff]  ;;  %v233_v32 = vstv %s449_s0  ;;  %vm242_vm3 = vcmask 31744   ;;  %vm167_vm4 = vcmask 0  }
   0x8   :  { %200 = vmatpush.msra.mxu0 %v193_v3  ;;  %v189_v7 = vld [vmem:[%s450_s1 + $0x40] sm:$0xff]  ;;  %v188_v8 = vld [vmem:[%s450_s1 + $0x38] sm:$0xff]  ;;  %v187_v9 = vld [vmem:[%s450_s1 + $0x30] sm:$0xff]  ;;  %v343_v44 = vmov 0.0   ;;  %v344_v52 = vmov 0   ;;  %s275_s14 = sshll.u32 %s455_s6, 4  ;;  %s276_s14 = int_to_ptr.hbm [resolvable:$true] %s275_s14 }
   0x9   :  { %v176_v10 = vld [vmem:[%s451_s2] sm:$0xff]  ;;  %v186_v12 = vld [vmem:[%s450_s1 + $0x28] sm:$0xff]  ;;  %v184_v15 = vld [vmem:[%s450_s1 + $0x18] sm:$0xff]  ;;  %168 = vst.msk [vmem:[#allocation2] sm:$0x1] %vm167_vm4, %v343_v44  ;;  %313 = vset.pattern.permute.xlu0 %v344_v52 }
   0xa   :  { %201 = vmatpush.msra.mxu0 %v192_v4  ;;  %v177_v11 = vld [vmem:[%s452_s3] sm:$0xff]  ;;  %v183_v16 = vld [vmem:[%s450_s1 + $0x10] sm:$0xff]  ;;  %v182_v18 = vld [vmem:[%s450_s1 + $0x8] sm:$0xff] }
   0xb   :  { %v185_v13 = vld [vmem:[%s450_s1 + $0x20] sm:$0xff]  ;;  %v178_v14 = vsub.f32 %v176_v10, %v177_v11 }
   0xc   :  { %202 = vmatpush.msra.mxu0 %v191_v5  ;;  %v181_v19 = vld [vmem:[%s450_s1] sm:$0xff] }
   0xd   :  { %v179_v17 = vadd.f32 1e-06, %v178_v14  ;;  %v217_v21 = vld [vmem:[%s454_s5] sm:$0xff] }
   0xe   :  { %203 = vmatpush.msra.mxu0 %v190_v6  ;;  %vm219_vm0 = vcmp.gt.f32.partialorder %v217_v21, 0.0  ;;  %v218_v36 = vld [vmem:[%s453_s4] sm:$0xff]  ;;  %s345_s4 = smov [#allocation4]  }
   0xf   :  { %v180_v20 = vmul.f32 %v179_v17, %v179_v17  ;;  %v237_v37 = vsub.f32 %v217_v21, %v218_v36  ;;  %s273_s11 = sshll.u32 %s345_s4, 4  ;;  %s274_s11 = int_to_ptr.vmem [resolvable:$true] %s273_s11 }
  0x10   :  { %204 = vmatpush.msra.mxu0 %v189_v7  ;;  %v241_v53 = vld [vmem:[#allocation2] sm:$0x1] }
  0x12   :  { %205 = vmatpush.msra.mxu0 %v188_v8 }
  0x14   :  { %206 = vmatpush.msra.mxu0 %v187_v9 }
  0x16   :  { %207 = vmatpush.msra.mxu0 %v186_v12 }
  0x18   :  { %208 = vmatpush.msra.mxu0 %v185_v13 }
  0x1a   :  { %209 = vmatpush.msra.mxu0 %v184_v15 }
  0x1c   :  { %210 = vmatpush.msra.mxu0 %v183_v16 }
  0x1e   :  { %211 = vmatpush.msra.mxu0 %v182_v18 }
  0x20   :  { %212 = vmatpush.msra.mxu0 %v181_v19 }
  0x21   :  { %213 = vmatmul.f32.vlgmr.msra.gmra.mxu0 %v180_v20 }
  0x9e   :  { %v214_v22 = vpop.f32.mrf.mxu0 }
  0x9f   :  { %v220_v23 = vsel %vm219_vm0, %v214_v22, 0.0 }
  0xa0   :  { %315 = vrsqrt.f32 %v220_v23  ;;  %vm228_vm1 = vcmp.eq.f32.partialorder %v220_v23, inf  ;;  %v231_v31 = vand.u32 2147483648, %v220_v23  ;;  %vm230_vm2 = vcmp.eq.f32.partialorder %v220_v23, 0.0 }
  0xa1   :  { %v236_v40 = vmul.f32 %v220_v23, %v218_v36 }
  0xa6   :  { %v316_v24 = vpop.eup %315 }
  0xa7   :  { %v222_v25 = vmul.f32 %v316_v24, %v220_v23 }
  0xa9   :  { %v223_v26 = vmul.f32 %v316_v24, %v222_v25 }
  0xab   :  { %v224_v27 = vmul.f32 0.5, %v223_v26 }
  0xad   :  { %v225_v28 = vsub.f32 1.5, %v224_v27 }
  0xaf   :  { %v226_v29 = vmul.f32 %v316_v24, %v225_v28 }
  0xb1   :  { %v227_v30 = vmul.f32 %v226_v29, %v220_v23 }
  0xb3   :  { %v229_v33 = vsel %vm228_vm1, %v220_v23, %v227_v30 }
  0xb4   :  { %v232_v34 = vsel %vm230_vm2, %v231_v31, %v229_v33 }
  0xb5   :  { %v234_v35 = vsub.f32 %v233_v32, %v232_v34 }
  0xb7   :  { %v235_v38 = vmax.f32 %v234_v35, 0.0 }
  0xb9   :  { %v238_v39 = vmul.f32 %v235_v38, %v235_v38 }
  0xbb   :  { %v239_v41 = vmul.f32 %v238_v39, %v237_v37 }
  0xbd   :  { %v240_v42 = vadd.f32 %v239_v41, %v236_v40 }
  0xbf   :  { %v243_v43 = vsel %vm242_vm3, %v240_v42, 0.0 }
  0xc0   :  { %244 = vadd.xlane.f32.xlu0 %v243_v43 }
 0x133   :  { %v245_v45 = vpop.xlane.xlu0 %244 }
 0x134   :  { %v246_v46 = vrot.slane %v245_v45, 4 }
 0x136   :  { %v247_v47 = vadd.f32 %v246_v46, %v245_v45 }
 0x138   :  { %v248_v48 = vrot.slane %v247_v47, 2 }
 0x13a   :  { %v249_v49 = vadd.f32 %v248_v48, %v247_v47 }
 0x13c   :  { %v250_v50 = vrot.slane %v249_v49, 1 }
 0x13e   :  { %v251_v51 = vadd.f32 %v250_v50, %v249_v49 }
 0x140   :  { %308 = vpush %v251_v51 }
 0x171   :  { %s309_s0 = spop %308 }
 0x172   :  { %v253_v54 = vstv %s309_s0 }
 0x173   :  { %v254_v55 = vadd.f32 %v253_v54, %v241_v53 }
 0x175   :  { %256 = vst.msk [vmem:[#allocation2] sm:$0x1] %vm167_vm4, %v254_v55 }
 0x17c   :  { %v314_v56 = vld [vmem:[#allocation2] ss:$0 sm:$0xff] }
 0x17d   :  { %264 = vperm.xlu0 %313, %v314_v56  }
 0x1ef   :  { %v265_v57 = vpop.permute.xlu0 %264 }
 0x1f0   :  { %267 = vst [vmem:[#allocation4] sm:$0xff] %v265_v57 }
 0x1f1   :  { %278 = dma.vmem_to_hbm [thread:$0]  %s274_s11, 128, %s276_s14, [#allocation5]  }
 0x1f2   :  { %341 = dma.done.wait [#allocation5], 128  }
 0x1f3   :  { %342 = vsyncadd [#allocation5], 4294967168 }
 0x1f4   :  { %283 = vsyncpa [#allocation5], 1 }

</bundles_post_ra>
